<compile_context>
chip_gen: v7x
topology: tpu7x:2x2x1
jax: 0.10.0
libtpu: 0.0.40
codegen_flags: <defaults>
</compile_context>

<pallas_src>
import dataclasses
import functools
from typing import Any, Tuple

import jax
import jax.numpy as jnp
from jax.experimental import pallas as pl
from jax.experimental.pallas import tpu as pltpu


def _round_up(x: int, m: int) -> int:
    return (x + m - 1) // m * m


@functools.lru_cache(maxsize=1)
def _device_vmem_bytes() -> int:
    """Physical per-core VMEM (64 MiB/TC on v7x, 128 MiB on v5e/v6e)."""
    try:
        return int(pltpu.get_tpu_info().vmem_capacity_bytes)
    except Exception:  # conservative fallback (v7x per-TC VMEM)
        return 64 * 1024 * 1024


# ---------------------------------------------------------------------------
# One-time parameter preparation (hoisted out of the per-call path).
# ---------------------------------------------------------------------------
@dataclasses.dataclass(frozen=True)
class PreparedFFNParams:
    w0_splits: Tuple[jax.Array, ...]   # per-embedding [d_i, H] slabs, compute dtype
    b0: jax.Array                      # (1, H) f32
    w1: jax.Array                      # (H, H) compute dtype
    b1: jax.Array                      # (1, H) f32
    w2: jax.Array                      # (H, N128) compute dtype, lane-padded
    b2: jax.Array                      # (1, N128) f32, lane-padded
    n_go: int                          # original (unpadded) output width
    emb_dims: Tuple[int, ...]          # per-embedding input widths
    compute_dtype: Any


def prepare_cafa5_ffn_params(params, emb_dims, *, compute_dtype=jnp.bfloat16):
    """Cast weights to the MXU compute dtype, split w0 rows per embedding
    source (so the kernel never materializes the HBM concat), reshape biases
    to (1, N) f32, and lane-pad w2/b2 to a multiple of 128.  Call once."""
    w0, b0, w1, b1, w2, b2 = params
    D_in, H = int(w0.shape[0]), int(w0.shape[1])
    n_go = int(w2.shape[1])
    if D_in != sum(int(d) for d in emb_dims):
        raise ValueError(f"w0 rows ({D_in}) != sum of embedding dims {emb_dims}")

    w0c = jnp.asarray(w0, compute_dtype)
    splits, off = [], 0
    for d in emb_dims:
        splits.append(w0c[off:off + d, :])
        off += d

    N128 = _round_up(n_go, 128)
    w2c = jnp.asarray(w2, compute_dtype)
    b2f = jnp.asarray(b2, jnp.float32).reshape(1, n_go)
    if N128 != n_go:
        w2c = jnp.pad(w2c, ((0, 0), (0, N128 - n_go)))
        b2f = jnp.pad(b2f, ((0, 0), (0, N128 - n_go)))

    return PreparedFFNParams(
        w0_splits=tuple(splits),
        b0=jnp.asarray(b0, jnp.float32).reshape(1, H),
        w1=jnp.asarray(w1, compute_dtype),
        b1=jnp.asarray(b1, jnp.float32).reshape(1, H),
        w2=w2c, b2=b2f, n_go=n_go,
        emb_dims=tuple(int(d) for d in emb_dims),
        compute_dtype=jnp.dtype(compute_dtype))


# ---------------------------------------------------------------------------
# Kernels
# ---------------------------------------------------------------------------
def _hidden_layers(xs, w0s, b0_ref, w1_ref, b1_ref, compute_dtype):
    """Layer 0 (split-K over embedding sources, no HBM concat) + ReLU,
    then layer 1 + ReLU.  Returns the f32 hidden activation."""
    acc = jnp.dot(xs[0][...], w0s[0][...], preferred_element_type=jnp.float32)
    for x_ref, w_ref in zip(xs[1:], w0s[1:]):
        acc = acc + jnp.dot(x_ref[...], w_ref[...],
                            preferred_element_type=jnp.float32)
    h = jnp.maximum(acc + b0_ref[...], 0.0).astype(compute_dtype)
    h = jnp.dot(h, w1_ref[...], preferred_element_type=jnp.float32) + b1_ref[...]
    return jnp.maximum(h, 0.0)


def _ffn_kernel_resident(*refs, n_emb, n_tiles, bn, compute_dtype):
    """Grid = (batch tiles,).  All weights resident in VMEM (fetched once).
    The output layer loops over lane-dense 128-multiple sub-tiles of the
    resident w2 so the f32 pre-sigmoid intermediate stays small."""
    xs = refs[:n_emb]
    w0s = refs[n_emb:2 * n_emb]
    b0_ref, w1_ref, b1_ref, w2_ref, b2_ref, o_ref = refs[2 * n_emb:]

    h = _hidden_layers(xs, w0s, b0_ref, w1_ref, b1_ref, compute_dtype)
    h = h.astype(compute_dtype)

    n_out = o_ref.shape[-1]
    for t in range(n_tiles):                              # static, unrolled
        lo = t * bn
        w = min(bn, n_out - lo)                           # 128-multiple (n_out is)
        z = jnp.dot(h, w2_ref[:, lo:lo + w], preferred_element_type=jnp.float32)
        z = z + b2_ref[:, lo:lo + w]
        o_ref[:, lo:lo + w] = jax.nn.sigmoid(z).astype(o_ref.dtype)


def _ffn_kernel_streamed(*refs, n_emb, compute_dtype):
    """Fallback for n_go too large for w2 residency.
    Grid = (batch tiles, n_go tiles); w2/b2 streamed along axis 1.  The hidden
    state is computed once per batch tile (j == 0) and cached in VMEM scratch.
    NOTE: only correct because grid axis 1 is sequential ("arbitrary") and j
    restarts at 0 for each batch tile on the same core."""
    xs = refs[:n_emb]
    w0s = refs[n_emb:2 * n_emb]
    b0_ref, w1_ref, b1_ref, w2_ref, b2_ref, o_ref, h_ref = refs[2 * n_emb:]

    j = pl.program_id(1)

    @pl.when(j == 0)
    def _():
        h = _hidden_layers(xs, w0s, b0_ref, w1_ref, b1_ref, compute_dtype)
        h_ref[...] = h.astype(h_ref.dtype)

    z = jnp.dot(h_ref[...], w2_ref[...], preferred_element_type=jnp.float32)
    o_ref[...] = jax.nn.sigmoid(z + b2_ref[...]).astype(o_ref.dtype)


# ---------------------------------------------------------------------------
# Tiling plan (device-aware)
# ---------------------------------------------------------------------------
def _plan_tiling(B, emb_dims, H, N128, block_b, block_n, compute_dtype,
                 out_dtype, force_streamed=False):
    """Pick (bm, bn, w2-resident?, vmem_limit) from static shapes and the
    device's physical VMEM."""
    budget = int(_device_vmem_bytes() * 0.9)               # ~10% headroom
    cbytes = jnp.dtype(compute_dtype).itemsize
    obytes = jnp.dtype(out_dtype).itemsize
    D_in = sum(emb_dims)

    def resident_bytes(bm_, bn_):
        v = 2 * bm_ * D_in * cbytes                        # x tiles (double-buffered)
        v += (D_in * H + H * H + H * N128) * cbytes        # resident w0 splits, w1, w2
        v += (2 * H + N128) * 4                            # resident f32 biases
        v += 2 * bm_ * N128 * obytes                       # output tile (double-buffered)
        v += 2 * bm_ * H * 4                               # f32 layer-0/1 accumulators
        v += bm_ * H * cbytes                              # bf16 hidden activation
        v += bm_ * bn_ * 4                                 # f32 pre-sigmoid sub-tile
        return v

    def streamed_bytes(bm_, bn_):
        v = 2 * bm_ * D_in * cbytes
        v += (D_in * H + H * H) * cbytes                   # resident w0 splits, w1
        v += 2 * H * 4
        v += 2 * (H * bn_ * cbytes + bn_ * 4)              # streamed w2/b2 tiles
        v += 2 * bm_ * bn_ * obytes                        # output tiles (double-buffered)
        v += bm_ * H * cbytes                              # hidden-state scratch
        v += 2 * bm_ * H * 4                               # f32 intermediates at j == 0
        v += bm_ * bn_ * 4                                 # f32 pre-sigmoid tile
        return v

    # bf16 packs 16 rows per sublane pair -> bm multiple of 16; block_b default
    # (512) keeps large batches on MXU-native 128-multiple row tiles.
    bm = _round_up(min(block_b, _round_up(B, 16)), 16)
    bn = _round_up(min(block_n, N128), 128)                # lane-dense 128-multiples

    resident = False
    if not force_streamed:
        rbm, rbn = bm, bn
        while resident_bytes(rbm, rbn) > budget and rbn > 128:
            rbn = max(128, _round_up(rbn // 2, 128))
        while resident_bytes(rbm, rbn) > budget and rbm > 16:
            rbm = max(16, _round_up(rbm // 2, 16))
        if resident_bytes(rbm, rbn) <= budget:
            resident, bm, bn = True, rbm, rbn

    if not resident:
        # w2 cannot be kept resident: stream it along an n_go grid axis and
        # amortize the per-batch-tile re-stream with the largest bm that fits.
        bm = _round_up(min(max(block_b, 512), _round_up(B, 16)), 16)
        while streamed_bytes(bm, bn) > budget and bn > 128:
            bn = max(128, _round_up(bn // 2, 128))
        while streamed_bytes(bm, bn) > budget and bm > 16:
            bm = max(16, _round_up(bm // 2, 16))

    # Megacore: v7x shards the parallel batch axis across 2 TensorCores, so
    # make sure there are >= 2 batch tiles whenever B allows it.
    if _round_up(B, bm) // bm < 2:
        half = max(16, _round_up(bm // 2, 16))
        if half < bm and _round_up(B, half) // half >= 2:
            bm = half

    footprint = resident_bytes(bm, bn) if resident else streamed_bytes(bm, bn)
    vmem_limit = int(min(budget, max(32 * 1024 * 1024, int(footprint * 1.25))))
    return bm, bn, resident, vmem_limit


# ---------------------------------------------------------------------------
# Forward
# ---------------------------------------------------------------------------
@functools.partial(
    jax.jit,
    static_argnames=("bm", "bn", "resident", "vmem_limit", "n_go", "out_dtype"),
)
def _forward_impl(embs, w0_splits, b0, w1, b1, w2, b2, *, bm, bn, resident,
                  vmem_limit, n_go, out_dtype):
    compute_dtype = w1.dtype
    n_emb = len(embs)
    emb_dims = tuple(int(e.shape[-1]) for e in embs)
    B = int(embs[0].shape[0])
    H = int(w1.shape[0])
    N128 = int(w2.shape[1])
    B_pad = _round_up(B, bm)

    xs = []
    for e in embs:
        e = e.astype(compute_dtype)
        if B_pad != B:
            e = jnp.pad(e, ((0, B_pad - B), (0, 0)))
        xs.append(e)

    keep = pl.Buffered(1)   # constant-index operands: single buffer, fetched once

    if resident:
        grid = (B_pad // bm,)
        in_specs = []
        for d in emb_dims:                                        # embeddings
            in_specs.append(pl.BlockSpec((bm, d), lambda i: (i, 0)))
        for d in emb_dims:                                        # w0 row-splits
            in_specs.append(pl.BlockSpec((d, H), lambda i: (0, 0), pipeline_mode=keep))
        in_specs += [
            pl.BlockSpec((1, H), lambda i: (0, 0), pipeline_mode=keep),      # b0
            pl.BlockSpec((H, H), lambda i: (0, 0), pipeline_mode=keep),      # w1
            pl.BlockSpec((1, H), lambda i: (0, 0), pipeline_mode=keep),      # b1
            pl.BlockSpec((H, N128), lambda i: (0, 0), pipeline_mode=keep),   # w2 (resident)
            pl.BlockSpec((1, N128), lambda i: (0, 0), pipeline_mode=keep),   # b2 (resident)
        ]
        kernel = functools.partial(
            _ffn_kernel_resident, n_emb=n_emb,
            n_tiles=-(-N128 // bn), bn=bn, compute_dtype=compute_dtype)
        out = pl.pallas_call(
            kernel,
            out_shape=jax.ShapeDtypeStruct((B_pad, N128), out_dtype),
            grid_spec=pltpu.PrefetchScalarGridSpec(
                num_scalar_prefetch=0, grid=grid,
                in_specs=in_specs,
                out_specs=pl.BlockSpec((bm, N128), lambda i: (i, 0))),
            compiler_params=pltpu.CompilerParams(
                dimension_semantics=("parallel",),
                vmem_limit_bytes=vmem_limit),
        )(*xs, *w0_splits, b0, w1, b1, w2, b2)
    else:
        N_pad = _round_up(N128, bn)
        if N_pad != N128:
            w2 = jnp.pad(w2, ((0, 0), (0, N_pad - N128)))
            b2 = jnp.pad(b2, ((0, 0), (0, N_pad - N128)))
        grid = (B_pad // bm, N_pad // bn)
        in_specs = []
        for d in emb_dims:
            in_specs.append(pl.BlockSpec((bm, d), lambda i, j: (i, 0)))
        for d in emb_dims:
            in_specs.append(pl.BlockSpec((d, H), lambda i, j: (0, 0), pipeline_mode=keep))
        in_specs += [
            pl.BlockSpec((1, H), lambda i, j: (0, 0), pipeline_mode=keep),   # b0
            pl.BlockSpec((H, H), lambda i, j: (0, 0), pipeline_mode=keep),   # w1
            pl.BlockSpec((1, H), lambda i, j: (0, 0), pipeline_mode=keep),   # b1
            pl.BlockSpec((H, bn), lambda i, j: (0, j)),                      # w2 (streamed)
            pl.BlockSpec((1, bn), lambda i, j: (0, j)),                      # b2 (streamed)
        ]
        kernel = functools.partial(
            _ffn_kernel_streamed, n_emb=n_emb, compute_dtype=compute_dtype)
        out = pl.pallas_call(
            kernel,
            out_shape=jax.ShapeDtypeStruct((B_pad, N_pad), out_dtype),
            grid_spec=pltpu.PrefetchScalarGridSpec(
                num_scalar_prefetch=0, grid=grid,
                in_specs=in_specs,
                out_specs=pl.BlockSpec((bm, bn), lambda i, j: (i, j)),
                scratch_shapes=[pltpu.VMEM((bm, H), compute_dtype)]),
            compiler_params=pltpu.CompilerParams(
                # Axis 1 MUST stay sequential: the h_ref cache is only valid
                # because j restarts at 0 for each batch tile on one core.
                dimension_semantics=("parallel", "arbitrary"),
                vmem_limit_bytes=vmem_limit),
        )(*xs, *w0_splits, b0, w1, b1, w2, b2)

    return out[:B, :n_go]


def cafa5_ffn_forward(prots_seq, params, *, block_b=512, block_n=512,
                      compute_dtype=jnp.bfloat16, out_dtype=jnp.float32,
                      _force_w2_streaming=False):
    """prots_seq: dict of embeddings (insertion order preserved, as in torch).
    params: PreparedFFNParams (preferred: one-time prep) or the raw
    (w0, b0, w1, b1, w2, b2) tuple with weights stored [in, out]."""
    # Extract embeddings in dict-insertion order OUTSIDE jit (jit's pytree
    # flattening sorts dict keys, which would change the concatenation order).
    embs = tuple(e for data_id, e in prots_seq.items()
                 if data_id not in ("amino_acids_tokens",))
    if not isinstance(params, PreparedFFNParams):
        emb_dims = tuple(int(e.shape[-1]) for e in embs)
        params = prepare_cafa5_ffn_params(params, emb_dims,
                                          compute_dtype=compute_dtype)
    p = params
    B = int(embs[0].shape[0])
    H = int(p.w1.shape[0])
    N128 = int(p.w2.shape[1])
    bm, bn, resident, vmem_limit = _plan_tiling(
        B, p.emb_dims, H, N128, block_b, block_n, p.compute_dtype, out_dtype,
        force_streamed=_force_w2_streaming)
    return _forward_impl(embs, p.w0_splits, p.b0, p.w1, p.b1, p.w2, p.b2,
                         bm=bm, bn=bn, resident=resident,
                         vmem_limit=vmem_limit, n_go=p.n_go,
                         out_dtype=out_dtype)


# ---------------------------------------------------------------------------
# References
# ---------------------------------------------------------------------------
def _reference(prots_seq, params, compute_dtype=jnp.bfloat16):
    """Mirrors the kernel numerics (bf16 matmul inputs, f32 accumulation)."""
    embs = [e for data_id, e in prots_seq.items()
            if data_id not in ("amino_acids_tokens",)]
    x = jnp.concatenate([e.astype(compute_dtype) for e in embs], axis=-1)
    w0, b0, w1, b1, w2, b2 = params
    h = jnp.dot(x, w0.astype(compute_dtype), preferred_element_type=jnp.float32) + b0
    h = jnp.maximum(h, 0.0).astype(compute_dtype)
    h = jnp.dot(h, w1.astype(compute_dtype), preferred_element_type=jnp.float32) + b1
    h = jnp.maximum(h, 0.0).astype(compute_dtype)
    z = jnp.dot(h, w2.astype(compute_dtype), preferred_element_type=jnp.float32) + b2
    return jax.nn.sigmoid(z)


def _reference_f32(prots_seq, params):
    embs = [e for data_id, e in prots_seq.items()
            if data_id not in ("amino_acids_tokens",)]
    x = jnp.concatenate(embs, axis=-1)
    w0, b0, w1, b1, w2, b2 = params
    h = jnp.maximum(x @ w0 + b0, 0.0)
    h = jnp.maximum(h @ w1 + b1, 0.0)
    return jax.nn.sigmoid(h @ w2 + b2)


if __name__ == "__main__":
    # Small shapes consistent with the module (real: 1024/1024/2560 embeddings).
    B = 24                                         # not a tile multiple -> padding path
    t5_size, protbert_size, esm2_size = 128, 128, 256   # D_in = 512
    hidden_size = 256
    n_go_codes = 200                               # not a 128-multiple -> lane padding
    D_in = t5_size + protbert_size + esm2_size
    emb_dims = (t5_size, protbert_size, esm2_size)

    key = jax.random.PRNGKey(0)
    k = jax.random.split(key, 10)

    prots_seq = {
        "t5_embeddings": jax.random.normal(k[0], (B, t5_size), jnp.float32),
        "protbert_embeddings": jax.random.normal(k[1], (B, protbert_size), jnp.float32),
        "esm2_embeddings": jax.random.normal(k[2], (B, esm2_size), jnp.float32),
        # present in the dict but excluded from concatenation by the forward:
        "amino_acids_tokens": jax.random.randint(k[3], (B, 16), 0, 20),
    }

    def init_linear(kw, kb, fan_in, fan_out):
        bound = 1.0 / jnp.sqrt(fan_in)
        w = jax.random.uniform(kw, (fan_in, fan_out), jnp.float32, -bound, bound)
        b = jax.random.uniform(kb, (1, fan_out), jnp.float32, -bound, bound)
        return w, b

    w0, b0 = init_linear(k[4], k[5], D_in, hidden_size)
    w1, b1 = init_linear(k[6], k[7], hidden_size, hidden_size)
    w2, b2 = init_linear(k[8], k[9], hidden_size, n_go_codes)
    params = (w0, b0, w1, b1, w2, b2)

    # One-time weight prep (bf16 cast, w0 split, w2/b2 lane padding).
    prepared = prepare_cafa5_ffn_params(params, emb_dims)

    # Primary (w2-resident) path; small block_n exercises the in-kernel
    # output sub-tile loop, and the small batch exercises the >=2-tile split.
    out = cafa5_ffn_forward(prots_seq, prepared, block_n=128)
    out = jax.block_until_ready(out)
    assert out.shape == (B, n_go_codes)

    # Streamed fallback path (forced), to validate it compiles and matches.
    out_streamed = cafa5_ffn_forward(prots_seq, prepared, block_n=128,
                                     _force_w2_streaming=True)
    out_streamed = jax.block_until_ready(out_streamed)
    assert out_streamed.shape == (B, n_go_codes)

    ref_bf16 = _reference(prots_seq, params)       # same bf16/f32-acc numerics
    ref_f32 = _reference_f32(prots_seq, params)    # pure f32 sanity check
    assert jnp.allclose(out, ref_bf16, atol=1e-2, rtol=0.0)
    assert jnp.allclose(out, ref_f32, atol=5e-2, rtol=0.0)
    assert jnp.allclose(out_streamed, ref_bf16, atol=1e-2, rtol=0.0)
    assert jnp.allclose(out_streamed, ref_f32, atol=5e-2, rtol=0.0)

    print("KERNEL_OK")
</pallas_src>

<mosaic_0001>
module attributes {stable_mosaic.version = 11 : i64} {
  func.func @_ffn_kernel_resident(%arg0: i32, %arg1: memref<16x128xbf16, #tpu.memory_space<vmem>>, %arg2: memref<16x128xbf16, #tpu.memory_space<vmem>>, %arg3: memref<16x256xbf16, #tpu.memory_space<vmem>>, %arg4: memref<128x256xbf16, #tpu.memory_space<vmem>>, %arg5: memref<128x256xbf16, #tpu.memory_space<vmem>>, %arg6: memref<256x256xbf16, #tpu.memory_space<vmem>>, %arg7: memref<1x256xf32, #tpu.memory_space<vmem>>, %arg8: memref<256x256xbf16, #tpu.memory_space<vmem>>, %arg9: memref<1x256xf32, #tpu.memory_space<vmem>>, %arg10: memref<256x256xbf16, #tpu.memory_space<vmem>>, %arg11: memref<1x256xf32, #tpu.memory_space<vmem>>, %arg12: memref<16x256xf32, #tpu.memory_space<vmem>>) attributes {dimension_semantics = [#tpu.dimension_semantics<parallel>], iteration_bounds = array<i64: 2>, scalar_prefetch = 0 : i64, scratch_operands = 0 : i64, tpu.core_type = #tpu.core_type<tc>, window_params = [{transform_indices = @transform_0, window_bounds = array<i64: 16, 128>}, {transform_indices = @transform_1, window_bounds = array<i64: 16, 128>}, {transform_indices = @transform_2, window_bounds = array<i64: 16, 256>}, {pipeline_mode = #tpu.pipeline_mode<synchronous>, transform_indices = @transform_3, window_bounds = array<i64: 128, 256>}, {pipeline_mode = #tpu.pipeline_mode<synchronous>, transform_indices = @transform_4, window_bounds = array<i64: 128, 256>}, {pipeline_mode = #tpu.pipeline_mode<synchronous>, transform_indices = @transform_5, window_bounds = array<i64: 256, 256>}, {pipeline_mode = #tpu.pipeline_mode<synchronous>, transform_indices = @transform_6, window_bounds = array<i64: 1, 256>}, {pipeline_mode = #tpu.pipeline_mode<synchronous>, transform_indices = @transform_7, window_bounds = array<i64: 256, 256>}, {pipeline_mode = #tpu.pipeline_mode<synchronous>, transform_indices = @transform_8, window_bounds = array<i64: 1, 256>}, {pipeline_mode = #tpu.pipeline_mode<synchronous>, transform_indices = @transform_9, window_bounds = array<i64: 256, 256>}, {pipeline_mode = #tpu.pipeline_mode<synchronous>, transform_indices = @transform_10, window_bounds = array<i64: 1, 256>}, {transform_indices = @transform_11, window_bounds = array<i64: 16, 256>}]} {
    %c0 = arith.constant 0 : index
    %c0_0 = arith.constant 0 : index
    %0 = vector.load %arg1[%c0, %c0_0] : memref<16x128xbf16, #tpu.memory_space<vmem>>, vector<16x128xbf16>
    %c0_1 = arith.constant 0 : index
    %c0_2 = arith.constant 0 : index
    %1 = vector.load %arg4[%c0_1, %c0_2] : memref<128x256xbf16, #tpu.memory_space<vmem>>, vector<128x256xbf16>
    %cst = arith.constant dense<0.000000e+00> : vector<16x256xf32>
    %2 = tpu.matmul %0, %1, %cst {dimension_numbers = #tpu.dot_dimension_numbers<[1], [0], [0], [1], [0, 0, 1, 1], [], []>} : vector<16x128xbf16>, vector<128x256xbf16>, vector<16x256xf32> -> vector<16x256xf32>
    %c0_3 = arith.constant 0 : index
    %c0_4 = arith.constant 0 : index
    %3 = vector.load %arg2[%c0_3, %c0_4] : memref<16x128xbf16, #tpu.memory_space<vmem>>, vector<16x128xbf16>
    %c0_5 = arith.constant 0 : index
    %c0_6 = arith.constant 0 : index
    %4 = vector.load %arg5[%c0_5, %c0_6] : memref<128x256xbf16, #tpu.memory_space<vmem>>, vector<128x256xbf16>
    %cst_7 = arith.constant dense<0.000000e+00> : vector<16x256xf32>
    %5 = tpu.matmul %3, %4, %cst_7 {dimension_numbers = #tpu.dot_dimension_numbers<[1], [0], [0], [1], [0, 0, 1, 1], [], []>} : vector<16x128xbf16>, vector<128x256xbf16>, vector<16x256xf32> -> vector<16x256xf32>
    %6 = arith.addf %2, %5 : vector<16x256xf32>
    %c0_8 = arith.constant 0 : index
    %c0_9 = arith.constant 0 : index
    %7 = vector.load %arg3[%c0_8, %c0_9] : memref<16x256xbf16, #tpu.memory_space<vmem>>, vector<16x256xbf16>
    %c0_10 = arith.constant 0 : index
    %c0_11 = arith.constant 0 : index
    %8 = vector.load %arg6[%c0_10, %c0_11] : memref<256x256xbf16, #tpu.memory_space<vmem>>, vector<256x256xbf16>
    %cst_12 = arith.constant dense<0.000000e+00> : vector<16x256xf32>
    %9 = tpu.matmul %7, %8, %cst_12 {dimension_numbers = #tpu.dot_dimension_numbers<[1], [0], [0], [1], [0, 0, 1, 1], [], []>} : vector<16x256xbf16>, vector<256x256xbf16>, vector<16x256xf32> -> vector<16x256xf32>
    %10 = arith.addf %6, %9 : vector<16x256xf32>
    %c0_13 = arith.constant 0 : index
    %c0_14 = arith.constant 0 : index
    %11 = vector.load %arg7[%c0_13, %c0_14] : memref<1x256xf32, #tpu.memory_space<vmem>>, vector<1x256xf32>
    %12 = vector.broadcast %11 : vector<1x256xf32> to vector<16x256xf32>
    %13 = arith.addf %10, %12 : vector<16x256xf32>
    %cst_15 = arith.constant 0.000000e+00 : f32
    %14 = vector.broadcast %cst_15 : f32 to vector<16x256xf32>
    %15 = arith.maximumf %13, %14 : vector<16x256xf32>
    %16 = arith.truncf %15 : vector<16x256xf32> to vector<16x256xbf16>
    %c0_16 = arith.constant 0 : index
    %c0_17 = arith.constant 0 : index
    %17 = vector.load %arg8[%c0_16, %c0_17] : memref<256x256xbf16, #tpu.memory_space<vmem>>, vector<256x256xbf16>
    %cst_18 = arith.constant dense<0.000000e+00> : vector<16x256xf32>
    %18 = tpu.matmul %16, %17, %cst_18 {dimension_numbers = #tpu.dot_dimension_numbers<[1], [0], [0], [1], [0, 0, 1, 1], [], []>} : vector<16x256xbf16>, vector<256x256xbf16>, vector<16x256xf32> -> vector<16x256xf32>
    %c0_19 = arith.constant 0 : index
    %c0_20 = arith.constant 0 : index
    %19 = vector.load %arg9[%c0_19, %c0_20] : memref<1x256xf32, #tpu.memory_space<vmem>>, vector<1x256xf32>
    %20 = vector.broadcast %19 : vector<1x256xf32> to vector<16x256xf32>
    %21 = arith.addf %18, %20 : vector<16x256xf32>
    %cst_21 = arith.constant 0.000000e+00 : f32
    %22 = vector.broadcast %cst_21 : f32 to vector<16x256xf32>
    %23 = arith.maximumf %21, %22 : vector<16x256xf32>
    %24 = arith.truncf %23 : vector<16x256xf32> to vector<16x256xbf16>
    %c0_22 = arith.constant 0 : index
    %c0_23 = arith.constant 0 : index
    %25 = vector.load %arg10[%c0_22, %c0_23] : memref<256x256xbf16, #tpu.memory_space<vmem>>, vector<256x128xbf16>
    %cst_24 = arith.constant dense<0.000000e+00> : vector<16x128xf32>
    %26 = tpu.matmul %24, %25, %cst_24 {dimension_numbers = #tpu.dot_dimension_numbers<[1], [0], [0], [1], [0, 0, 1, 1], [], []>} : vector<16x256xbf16>, vector<256x128xbf16>, vector<16x128xf32> -> vector<16x128xf32>
    %c0_25 = arith.constant 0 : index
    %c0_26 = arith.constant 0 : index
    %27 = vector.load %arg11[%c0_25, %c0_26] : memref<1x256xf32, #tpu.memory_space<vmem>>, vector<1x128xf32>
    %28 = vector.broadcast %27 : vector<1x128xf32> to vector<16x128xf32>
    %29 = arith.addf %26, %28 : vector<16x128xf32>
    %30 = arith.negf %29 : vector<16x128xf32>
    %31 = math.exp %30 : vector<16x128xf32>
    %cst_27 = arith.constant 1.000000e+00 : f32
    %32 = vector.broadcast %cst_27 : f32 to vector<16x128xf32>
    %33 = arith.addf %32, %31 : vector<16x128xf32>
    %34 = arith.divf %32, %33 : vector<16x128xf32>
    %c0_28 = arith.constant 0 : index
    %c0_29 = arith.constant 0 : index
    %35 = vector.load %arg12[%c0_28, %c0_29] : memref<16x256xf32, #tpu.memory_space<vmem>>, vector<16x128xf32>
    tpu.vector_store %arg12[%c0_28, %c0_29], %34 {strides = array<i32>} : memref<16x256xf32, #tpu.memory_space<vmem>>, vector<16x128xf32>,
    %c0_30 = arith.constant 0 : index
    %c128 = arith.constant 128 : index
    %36 = vector.load %arg10[%c0_30, %c128] : memref<256x256xbf16, #tpu.memory_space<vmem>>, vector<256x128xbf16>
    %cst_31 = arith.constant dense<0.000000e+00> : vector<16x128xf32>
    %37 = tpu.matmul %24, %36, %cst_31 {dimension_numbers = #tpu.dot_dimension_numbers<[1], [0], [0], [1], [0, 0, 1, 1], [], []>} : vector<16x256xbf16>, vector<256x128xbf16>, vector<16x128xf32> -> vector<16x128xf32>
    %c0_32 = arith.constant 0 : index
    %c128_33 = arith.constant 128 : index
    %38 = vector.load %arg11[%c0_32, %c128_33] : memref<1x256xf32, #tpu.memory_space<vmem>>, vector<1x128xf32>
    %39 = vector.broadcast %38 : vector<1x128xf32> to vector<16x128xf32>
    %40 = arith.addf %37, %39 : vector<16x128xf32>
    %41 = arith.negf %40 : vector<16x128xf32>
    %42 = math.exp %41 : vector<16x128xf32>
    %cst_34 = arith.constant 1.000000e+00 : f32
    %43 = vector.broadcast %cst_34 : f32 to vector<16x128xf32>
    %44 = arith.addf %43, %42 : vector<16x128xf32>
    %45 = arith.divf %43, %44 : vector<16x128xf32>
    %c0_35 = arith.constant 0 : index
    %c128_36 = arith.constant 128 : index
    %46 = vector.load %arg12[%c0_35, %c128_36] : memref<16x256xf32, #tpu.memory_space<vmem>>, vector<16x128xf32>
    tpu.vector_store %arg12[%c0_35, %c128_36], %45 {strides = array<i32>} : memref<16x256xf32, #tpu.memory_space<vmem>>, vector<16x128xf32>,
    return
  }
  func.func @transform_0(%arg0: i32) -> (i32, i32) {
    %c0_i32 = arith.constant 0 : i32
    %c0_i32_0 = arith.constant 0 : i32
    return %arg0, %c0_i32 : i32, i32
  }
  func.func @transform_1(%arg0: i32) -> (i32, i32) {
    %c0_i32 = arith.constant 0 : i32
    %c0_i32_0 = arith.constant 0 : i32
    return %arg0, %c0_i32 : i32, i32
  }
  func.func @transform_2(%arg0: i32) -> (i32, i32) {
    %c0_i32 = arith.constant 0 : i32
    %c0_i32_0 = arith.constant 0 : i32
    return %arg0, %c0_i32 : i32, i32
  }
  func.func @transform_3(%arg0: i32) -> (i32, i32) {
    %c0_i32 = arith.constant 0 : i32
    %c0_i32_0 = arith.constant 0 : i32
    %c0_i32_1 = arith.constant 0 : i32
    return %c0_i32, %c0_i32_0 : i32, i32
  }
  func.func @transform_4(%arg0: i32) -> (i32, i32) {
    %c0_i32 = arith.constant 0 : i32
    %c0_i32_0 = arith.constant 0 : i32
    %c0_i32_1 = arith.constant 0 : i32
    return %c0_i32, %c0_i32_0 : i32, i32
  }
  func.func @transform_5(%arg0: i32) -> (i32, i32) {
    %c0_i32 = arith.constant 0 : i32
    %c0_i32_0 = arith.constant 0 : i32
    %c0_i32_1 = arith.constant 0 : i32
    return %c0_i32, %c0_i32_0 : i32, i32
  }
  func.func @transform_6(%arg0: i32) -> (i32, i32) {
    %c0_i32 = arith.constant 0 : i32
    %c0_i32_0 = arith.constant 0 : i32
    %c0_i32_1 = arith.constant 0 : i32
    return %c0_i32, %c0_i32_0 : i32, i32
  }
  func.func @transform_7(%arg0: i32) -> (i32, i32) {
    %c0_i32 = arith.constant 0 : i32
    %c0_i32_0 = arith.constant 0 : i32
    %c0_i32_1 = arith.constant 0 : i32
    return %c0_i32, %c0_i32_0 : i32, i32
  }
  func.func @transform_8(%arg0: i32) -> (i32, i32) {
    %c0_i32 = arith.constant 0 : i32
    %c0_i32_0 = arith.constant 0 : i32
    %c0_i32_1 = arith.constant 0 : i32
    return %c0_i32, %c0_i32_0 : i32, i32
  }
  func.func @transform_9(%arg0: i32) -> (i32, i32) {
    %c0_i32 = arith.constant 0 : i32
    %c0_i32_0 = arith.constant 0 : i32
    %c0_i32_1 = arith.constant 0 : i32
    return %c0_i32, %c0_i32_0 : i32, i32
  }
  func.func @transform_10(%arg0: i32) -> (i32, i32) {
    %c0_i32 = arith.constant 0 : i32
    %c0_i32_0 = arith.constant 0 : i32
    %c0_i32_1 = arith.constant 0 : i32
    return %c0_i32, %c0_i32_0 : i32, i32
  }
  func.func @transform_11(%arg0: i32) -> (i32, i32) {
    %c0_i32 = arith.constant 0 : i32
    %c0_i32_0 = arith.constant 0 : i32
    return %arg0, %c0_i32 : i32, i32
  }
}

</mosaic_0001>

<bundles_post_ra>
// kernel: _forward_impl.1
= control target key start
LH: loop header
LB: loop body
LE: loop exit
PB: predicated region body
PF: predicated region fallthrough
CT: control target
= control target key end

     0   :  { %s2778_s0 = inlined_call_operand.vmem [shape: bf16[32,128], index: 0, kind: input, shape index: {}]   ;;  %s2779_s1 = inlined_call_operand.vmem [shape: bf16[32,128], index: 1, kind: input, shape index: {}]   ;;  %s2780_s2 = inlined_call_operand.vmem [shape: bf16[32,256], index: 2, kind: input, shape index: {}]   ;;  %s2781_s3 = inlined_call_operand.hbm [shape: bf16[128,256], index: 3, kind: input, shape index: {}]   ;;  %s2782_s4 = inlined_call_operand.hbm [shape: bf16[128,256], index: 4, kind: input, shape index: {}]   ;;  %s2783_s5 = inlined_call_operand.vmem [shape: bf16[256,256], index: 5, kind: input, shape index: {}]   ;;  %s2784_s6 = inlined_call_operand.vmem [shape: f32[1,256], index: 6, kind: input, shape index: {}]   ;;  %s2785_s7 = inlined_call_operand.hbm [shape: bf16[256,256], index: 7, kind: input, shape index: {}]   ;;  %s2786_s8 = inlined_call_operand.vmem [shape: f32[1,256], index: 8, kind: input, shape index: {}]   ;;  %s2787_s9 = inlined_call_operand.hbm [shape: bf16[256,256], index: 9, kind: input, shape index: {}]   ;;  %s2788_s10 = inlined_call_operand.vmem [shape: f32[1,256], index: 10, kind: input, shape index: {}]   ;;  %s2789_s11 = inlined_call_operand.vmem [shape: f32[32,256], index: 11, kind: output, shape index: {}]  }
   0x1   :  { %2794 = sst [smem:[#allocation12_spill]] %s2789_s11 }
   0x2   :  { %16 = vsyncpa [#allocation3], 0 }
   0x3   :  { %17 = vsyncpa [#allocation5], 0 }
   0x4   :  { %18 = vsyncpa [#allocation8], 0  ;;  %s2487_s17 = smov 0  }
   0x5 LB: > { %s2790_s18 = sadd.s32 4294967295, %s2418_s17   ;;  %p1824_p0 = scmp.ge.s32.totalorder %s2418_s17, 1  ;;  %s2418_s17 = sphi %s2487_s17, %s24_s17  }
   0x6   : > { %p301_p1 = scmp.lt.s32.totalorder %s2418_s17, 3  ;;  %p2497_p2 = scmp.eq.s32.totalorder %s2790_s18, 0 }
   0x7   : > { %s2420_s21 = smov [#allocation4]   ;;  %s2421_s23 = smov [#allocation2]  }
   0x8   : > { %s2795_s19 = scalar_select %p2497_p2, 1, 0 }
   0x9   : > { %p2501_p3 = pnand %p1824_p0, %p301_p1  ;;  %s326_s22 = sshll.u32 %s2420_s21, 4  ;;  %s2505_s22 = int_to_ptr.vmem [resolvable:$true] %s326_s22 }
   0xa   : > { %s313_s24 = sshll.u32 %s2421_s23, 4  ;;  %s2422_s26 = smov [#allocation6]   ;;  %s2509_s24 = int_to_ptr.vmem [resolvable:$true] %s313_s24 }
   0xb   : > { %s2796_s20 = scalar_select %p2501_p3, 1, 0 }
   0xc   : > { %p2055_p4 = pneg %p2501_p3  ;;  %s345_s27 = sshll.u32 %s2422_s26, 4  ;;  %s2517_s27 = int_to_ptr.vmem [resolvable:$true] %s345_s27 }
   0xd   : > { %s2423_s28 = smov [#allocation7]   ;;  %s2288_s13 = scalar_lea.hbm %s2782_s4, 2048 }
   0xe   : > { %p2513_p5 = pnand %p2497_p2, %p2055_p4  ;;  %s2519_s29 = sshll.u32 %s2423_s28, 4  ;;  %s362_s29 = int_to_ptr.vmem [resolvable:$true] %s2519_s29 }
   0xf   : > { %p2289_p6 = scmp.ne.s32.totalorder %s2782_s4, %s2288_s13  ;;  %p2295_p10 = scmp.lt.u32.totalorder %s2288_s13, %s2782_s4 }
  0x10   : > { %p2529_p7 = pneg %p2513_p5 }
  0x12   : > { %p2291_p8 = pnand %p2529_p7, %p2289_p6 }
  0x14   : > { %p2292_p9 = pneg %p2291_p8 }
  0x16   : > { %p2297_p11 = pnand %p2295_p10, %p2292_p9 }
  0x18   : > { %2300 = shalt.err (!%p2297_p11)
}
  0x19   : > { %s2301_s26 = scalar_lea.vmem %s2505_s22, 2048  ;;  %p2309_p1 = scmp.lt.s32.totalorder %s2505_s22, %s2505_s22 }
  0x1a   : > { %p2302_p12 = scmp.ne.s32.totalorder %s2505_s22, %s2301_s26  ;;  %p2310_p4 = scmp.lt.s32.totalorder %s2301_s26, %s2301_s26 }
  0x1c   : > { %p2304_p13 = pnand %p2302_p12, %p2529_p7  ;;  %p2311_p6 = por %p2310_p4, %p2309_p1 }
  0x1e   : > { %p2305_p0 = pneg %p2304_p13 }
  0x20   : > { %p2312_p8 = pnand %p2311_p6, %p2305_p0 }
  0x22   : > { %2315 = shalt.err (!%p2312_p8)
}
  0x23   : > { %s2424_s28 = smov 128   ;;  %s2425_s30 = smov 8  }
  0x24   : > { %2061 = dma.hbm_to_vmem [thread:$0]  (!%p2513_p5), %s2782_s4, 2048, %s2505_s22, [#allocation5], %s2424_s28, %s2424_s28, %s2425_s30  }
  0x25   : > { %s2316_s21 = scalar_lea.hbm %s2781_s3, 2048 }
  0x26   : > { %p2317_p9 = scmp.ne.s32.totalorder %s2781_s3, %s2316_s21  ;;  %p2323_p12 = scmp.lt.u32.totalorder %s2316_s21, %s2781_s3 }
  0x28   : > { %p2319_p10 = pnand %p2317_p9, %p2529_p7 }
  0x2a   : > { %p2320_p11 = pneg %p2319_p10 }
  0x2c   : > { %p2325_p13 = pnand %p2323_p12, %p2320_p11 }
  0x2e   : > { %2328 = shalt.err (!%p2325_p13)
}
  0x2f   : > { %s2329_s22 = scalar_lea.vmem %s2509_s24, 2048  ;;  %p2337_p6 = scmp.lt.s32.totalorder %s2509_s24, %s2509_s24 }
  0x30   : > { %p2330_p0 = scmp.ne.s32.totalorder %s2509_s24, %s2329_s22  ;;  %p2338_p8 = scmp.lt.s32.totalorder %s2329_s22, %s2329_s22 }
  0x32   : > { %p2332_p1 = pnand %p2330_p0, %p2529_p7  ;;  %p2339_p9 = por %p2338_p8, %p2337_p6 }
  0x34   : > { %p2333_p4 = pneg %p2332_p1 }
  0x36   : > { %p2340_p10 = pnand %p2339_p9, %p2333_p4 }
  0x38   : > { %2343 = shalt.err (!%p2340_p10)
}
  0x39   : > { %2058 = dma.hbm_to_vmem [thread:$0]  (!%p2513_p5), %s2781_s3, 2048, %s2509_s24, [#allocation3], %s2424_s28, %s2424_s28, %s2425_s30  }
  0x3a   : > { %s2344_s14 = scalar_lea.hbm %s2785_s7, 4096 }
  0x3b   : > { %p2345_p11 = scmp.ne.s32.totalorder %s2785_s7, %s2344_s14  ;;  %p2351_p0 = scmp.lt.u32.totalorder %s2344_s14, %s2785_s7 }
  0x3d   : > { %p2347_p12 = pnand %p2345_p11, %p2529_p7 }
  0x3f   : > { %p2348_p13 = pneg %p2347_p12 }
  0x41   : > { %p2353_p1 = pnand %p2351_p0, %p2348_p13 }
  0x43   : > { %2356 = shalt.err (!%p2353_p1)
}
  0x44   : > { %s2357_s24 = scalar_lea.vmem %s2517_s27, 4096  ;;  %p2365_p9 = scmp.lt.s32.totalorder %s2517_s27, %s2517_s27 }
  0x45   : > { %p2358_p4 = scmp.ne.s32.totalorder %s2517_s27, %s2357_s24  ;;  %p2366_p10 = scmp.lt.s32.totalorder %s2357_s24, %s2357_s24 }
  0x47   : > { %p2360_p6 = pnand %p2358_p4, %p2529_p7  ;;  %p2367_p11 = por %p2366_p10, %p2365_p9 }
  0x49   : > { %p2361_p8 = pneg %p2360_p6 }
  0x4b   : > { %p2368_p12 = pnand %p2367_p11, %p2361_p8 }
  0x4d   : > { %2371 = shalt.err (!%p2368_p12)
}
  0x4e   : > { %2064 = dma.hbm_to_vmem [thread:$0]  (!%p2513_p5), %s2785_s7, 4096, %s2517_s27, [#allocation5], %s2424_s28, %s2424_s28, %s2425_s30  }
  0x4f   : > { %s2372_s13 = scalar_lea.hbm %s2787_s9, 4096 }
  0x50   : > { %p2373_p13 = scmp.ne.s32.totalorder %s2787_s9, %s2372_s13  ;;  %p2379_p4 = scmp.lt.u32.totalorder %s2372_s13, %s2787_s9 }
  0x52   : > { %p2375_p0 = pnand %p2373_p13, %p2529_p7 }
  0x54   : > { %p2376_p1 = pneg %p2375_p0 }
  0x56   : > { %p2381_p6 = pnand %p2379_p4, %p2376_p1 }
  0x58   : > { %2384 = shalt.err (!%p2381_p6)
}
  0x59   : > { %s2385_s26 = scalar_lea.vmem %s362_s29, 4096  ;;  %p2393_p11 = scmp.lt.s32.totalorder %s362_s29, %s362_s29 }
  0x5a   : > { %p2386_p8 = scmp.ne.s32.totalorder %s362_s29, %s2385_s26  ;;  %p2394_p12 = scmp.lt.s32.totalorder %s2385_s26, %s2385_s26 }
  0x5c   : > { %p2388_p9 = pnand %p2386_p8, %p2529_p7  ;;  %p2395_p2 = por %p2394_p12, %p2393_p11 }
  0x5e   : > { %p2389_p10 = pneg %p2388_p9 }
  0x60   : > { %p2396_p3 = pnand %p2395_p2, %p2389_p10 }
  0x62   : > { %2399 = shalt.err (!%p2396_p3)
}
  0x63   : > { %2067 = dma.hbm_to_vmem [thread:$0]  (!%p2513_p5), %s2787_s9, 4096, %s362_s29, [#allocation8], %s2424_s28, %s2424_s28, %s2425_s30  }
  0x64   : > { %p2799_p13 = scmp.ne.s32.totalorder %s2796_s20, 0 }
  0x65   : > { %p2800_p7 = scmp.ne.s32.totalorder (!%p2799_p13), %s2795_s19, 0 }
  0x66   : > { %408 = sbr.rel (%p2799_p13) target bundleno = 965 (0x3c5), region = 64 }
  0x6d   : > { %2405 = dma.done.wait (%p2800_p7), [#allocation3], 2048  }
  0x6e   : > { %2407 = vsyncadd (%p2800_p7), [#allocation3], 4294965248 }
  0x6f   : > { %2409 = dma.done.wait (%p2800_p7), [#allocation5], 6144  }
  0x70   : > { %2411 = vsyncadd (%p2800_p7), [#allocation5], 4294961152 }
  0x71   : > { %2413 = dma.done.wait (%p2800_p7), [#allocation8], 4096  }
  0x72   : > { %2415 = vsyncadd (%p2800_p7), [#allocation8], 4294963200  ;;  %v2426_v0 = vmov 0   ;;  %s2801_s20 = sadd.s32 4294967295, %s2418_s17   ;;  %v2091_v1 = vld [vmem:[#allocation4 + $0x4] ss:$8 sps:$4 sm:$0xff]  }
  0x73   : > { %653 = vmatprep.mubr.bf16.mxu0 %v2426_v0  ;;  %s1835_s25 = sshll.u32 %s2801_s20, 1  ;;  %v2093_v2 = vld [vmem:[#allocation4] ss:$8 sps:$4 sm:$0xff]   ;;  %621 = vmatprep.subr.bf16.mxu0 %v2091_v1  ;;  %v2094_v3 = vld [vmem:[#allocation4 + $0x14] ss:$8 sps:$4 sm:$0xff]   ;;  %s2802_s27 = sld [smem:[#allocation12_spill]] }
  0x74   : > { %p473_p2 = scmp.lt.s32.totalorder %s1835_s25, 3  ;;  %622 = vmatpush1.bf16.msra.mxu0 %v2093_v2  ;;  %v2096_v4 = vld [vmem:[#allocation4 + $0x10] ss:$8 sps:$4 sm:$0xff]   ;;  %v2097_v5 = vld [vmem:[#allocation4 + $0x24] ss:$8 sps:$4 sm:$0xff]  }
  0x75   : > { %623 = vmatprep.subr.bf16.mxu0 %v2094_v3  ;;  %v2099_v6 = vld [vmem:[#allocation4 + $0x20] ss:$8 sps:$4 sm:$0xff]   ;;  %v2100_v7 = vld [vmem:[#allocation4 + $0x34] ss:$8 sps:$4 sm:$0xff]   ;;  %v2102_v8 = vld [vmem:[#allocation4 + $0x30] ss:$8 sps:$4 sm:$0xff]  }
  0x76   : > { %s2804_s25 = smov (!%p473_p2, %s1835_s25), 3  ;;  %v2103_v9 = vld [vmem:[#allocation4 + $0x44] ss:$8 sps:$4 sm:$0xff]   ;;  %v2105_v10 = vld [vmem:[#allocation4 + $0x40] ss:$8 sps:$4 sm:$0xff]  }
  0x77   : > { %s1836_s19 = sshll.u32 %s2804_s25, 2  ;;  %v2106_v11 = vld [vmem:[#allocation4 + $0x54] ss:$8 sps:$4 sm:$0xff]   ;;  %v2108_v12 = vld [vmem:[#allocation4 + $0x50] ss:$8 sps:$4 sm:$0xff]   ;;  %s1985_s18 = sshll.u32 %s2804_s25, 3 }
  0x78   : > { %624 = vmatpush1.bf16.msra.mxu0 %v2096_v4  ;;  %s482_s28 = scalar_lea.vmem %s2779_s1, %s1836_s19  ;;  %v2109_v13 = vld [vmem:[#allocation4 + $0x64] ss:$8 sps:$4 sm:$0xff]   ;;  %s2652_s11 = scalar_lea.vmem %s2778_s0, %s1836_s19  ;;  %v2111_v14 = vld [vmem:[#allocation4 + $0x60] ss:$8 sps:$4 sm:$0xff]   ;;  %v2112_v15 = vld [vmem:[#allocation4 + $0x74] ss:$8 sps:$4 sm:$0xff]  }
  0x79   : > { %625 = vmatprep.subr.bf16.mxu0 %v2097_v5  ;;  %v2114_v16 = vld [vmem:[#allocation4 + $0x70] ss:$8 sps:$4 sm:$0xff]   ;;  %v2117_v17 = vld [vmem:[#allocation2 + $0x4] ss:$8 sps:$4 sm:$0xff]   ;;  %v2115_v19 = vld [vmem:[#allocation2] ss:$8 sps:$4 sm:$0xff]   ;;  %s2658_s14 = scalar_lea.vmem %s2780_s2, %s1985_s18 }
  0x7a   : > { %v2118_v18 = vld [vmem:[%s482_s28] sm:$0xff]   ;;  %v2124_v22 = vld [vmem:[#allocation2 + $0x24] ss:$8 sps:$4 sm:$0xff]   ;;  %v2122_v23 = vld [vmem:[#allocation2 + $0x20] ss:$8 sps:$4 sm:$0xff]   ;;  %s1986_s21 = sshll.u32 %s2804_s25, 4 }
  0x7b   : > { %v2121_v20 = vld [vmem:[#allocation2 + $0x14] ss:$8 sps:$4 sm:$0xff]   ;;  %v2119_v21 = vld [vmem:[#allocation2 + $0x10] ss:$8 sps:$4 sm:$0xff]   ;;  %v2130_v26 = vld [vmem:[#allocation2 + $0x44] ss:$8 sps:$4 sm:$0xff]   ;;  %s496_s24 = scalar_lea.vmem %s2802_s27, %s1986_s21 }
  0x7c   : > { %626 = vmatpush1.bf16.msra.mxu0 %v2099_v6  ;;  %v2127_v24 = vld [vmem:[#allocation2 + $0x34] ss:$8 sps:$4 sm:$0xff]   ;;  %v2125_v25 = vld [vmem:[#allocation2 + $0x30] ss:$8 sps:$4 sm:$0xff]   ;;  %v2128_v27 = vld [vmem:[#allocation2 + $0x40] ss:$8 sps:$4 sm:$0xff]  }
  0x7d   : > { %627 = vmatprep.subr.bf16.mxu0 %v2100_v7  ;;  %v2192_v28 = vld [vmem:[#allocation6 + $0x4] ss:$8 sps:$4 sm:$0xff]   ;;  %v2194_v29 = vld [vmem:[#allocation6] ss:$8 sps:$4 sm:$0xff]   ;;  %v2133_v30 = vld [vmem:[#allocation2 + $0x54] ss:$8 sps:$4 sm:$0xff]  }
  0x7e   : > { %1270 = vmatprep.subr.bf16.mxu1 %v2192_v28  ;;  %v2195_v31 = vld [vmem:[#allocation6 + $0x14] ss:$8 sps:$4 sm:$0xff]   ;;  %v2197_v32 = vld [vmem:[#allocation6 + $0x10] ss:$8 sps:$4 sm:$0xff]   ;;  %v2198_v33 = vld [vmem:[#allocation6 + $0x24] ss:$8 sps:$4 sm:$0xff]  }
  0x7f   : > { %1271 = vmatpush1.bf16.msra.mxu1 %v2194_v29  ;;  %v2131_v34 = vld [vmem:[#allocation2 + $0x50] ss:$8 sps:$4 sm:$0xff]   ;;  %v2136_v35 = vld [vmem:[#allocation2 + $0x64] ss:$8 sps:$4 sm:$0xff]   ;;  %v2200_v36 = vld [vmem:[#allocation6 + $0x20] ss:$8 sps:$4 sm:$0xff]  }
  0x80   : > { %628 = vmatpush1.bf16.msra.mxu0 %v2102_v8  ;;  %1272 = vmatprep.subr.bf16.mxu1 %v2195_v31  ;;  %v2201_v37 = vld [vmem:[#allocation6 + $0x34] ss:$8 sps:$4 sm:$0xff]   ;;  %v2134_v38 = vld [vmem:[#allocation2 + $0x60] ss:$8 sps:$4 sm:$0xff]   ;;  %v2203_v40 = vld [vmem:[#allocation6 + $0x30] ss:$8 sps:$4 sm:$0xff]  }
  0x81   : > { %629 = vmatprep.subr.bf16.mxu0 %v2103_v9  ;;  %v2139_v39 = vld [vmem:[#allocation2 + $0x74] ss:$8 sps:$4 sm:$0xff]   ;;  %v2204_v41 = vld [vmem:[#allocation6 + $0x44] ss:$8 sps:$4 sm:$0xff]   ;;  %v2137_v42 = vld [vmem:[#allocation2 + $0x70] ss:$8 sps:$4 sm:$0xff]  }
  0x82   : > { %v2142_v43 = vld [vmem:[%s2783_s5 + $0x4] ss:$8 sps:$4 sm:$0xff]   ;;  %v2140_v45 = vld [vmem:[%s2783_s5] ss:$8 sps:$4 sm:$0xff]   ;;  %v2206_v47 = vld [vmem:[#allocation6 + $0x40] ss:$8 sps:$4 sm:$0xff]  }
  0x83   : > { %1273 = vmatpush1.bf16.msra.mxu1 %v2197_v32  ;;  %v2143_v44 = vld [vmem:[%s2652_s11] sm:$0xff]   ;;  %v2146_v48 = vld [vmem:[%s2783_s5 + $0x14] ss:$8 sps:$4 sm:$0xff]   ;;  %v2144_v52 = vld [vmem:[%s2783_s5 + $0x10] ss:$8 sps:$4 sm:$0xff]  }
  0x84   : > { %630 = vmatpush1.bf16.msra.mxu0 %v2105_v10  ;;  %1274 = vmatprep.subr.bf16.mxu1 %v2198_v33  ;;  %v2191_v46 = vld [vmem:[%s2658_s14 + $0x4] ss:$8 sps:$4 sm:$0xff]   ;;  %v2209_v50 = vld [vmem:[#allocation6 + $0x50] ss:$8 sps:$4 sm:$0xff]   ;;  %v2210_v51 = vld [vmem:[#allocation6 + $0x64] ss:$8 sps:$4 sm:$0xff]  }
  0x85   : > { %631 = vmatprep.subr.bf16.mxu0 %v2106_v11  ;;  %v2207_v49 = vld [vmem:[#allocation6 + $0x54] ss:$8 sps:$4 sm:$0xff]   ;;  %v2212_v54 = vld [vmem:[#allocation6 + $0x60] ss:$8 sps:$4 sm:$0xff]   ;;  %v2147_v56 = vld [vmem:[%s2783_s5 + $0x20] ss:$8 sps:$4 sm:$0xff]  }
  0x86   : > { %v2149_v53 = vld [vmem:[%s2783_s5 + $0x24] ss:$8 sps:$4 sm:$0xff]   ;;  %v2152_v57 = vld [vmem:[%s2783_s5 + $0x34] ss:$8 sps:$4 sm:$0xff]   ;;  %v2215_v58 = vld [vmem:[#allocation6 + $0x70] ss:$8 sps:$4 sm:$0xff]  }
  0x87   : > { %1275 = vmatpush1.bf16.msra.mxu1 %v2200_v36  ;;  %v2213_v55 = vld [vmem:[#allocation6 + $0x74] ss:$8 sps:$4 sm:$0xff]   ;;  %v2216_v59 = vld [vmem:[#allocation6 + $0x84] ss:$8 sps:$4 sm:$0xff]   ;;  %v2150_v60 = vld [vmem:[%s2783_s5 + $0x30] ss:$8 sps:$4 sm:$0xff]  }
  0x88   : > { %632 = vmatpush1.bf16.msra.mxu0 %v2108_v12  ;;  %1276 = vmatprep.subr.bf16.mxu1 %v2201_v37  ;;  %v2155_v61 = vld [vmem:[%s2783_s5 + $0x44] ss:$8 sps:$4 sm:$0xff]   ;;  %v2218_v62 = vld [vmem:[#allocation6 + $0x80] ss:$8 sps:$4 sm:$0xff]   ;;  %v2158_v1 = vld [vmem:[%s2783_s5 + $0x54] ss:$8 sps:$4 sm:$0xff]  }
  0x89   : > { %633 = vmatprep.subr.bf16.mxu0 %v2109_v13  ;;  %v2219_v63 = vld [vmem:[#allocation6 + $0x94] ss:$8 sps:$4 sm:$0xff]   ;;  %v2221_v2 = vld [vmem:[#allocation6 + $0x90] ss:$8 sps:$4 sm:$0xff]   ;;  %v2222_v3 = vld [vmem:[#allocation6 + $0xa4] ss:$8 sps:$4 sm:$0xff]  }
  0x8a   : > { %v2156_v4 = vld [vmem:[%s2783_s5 + $0x50] ss:$8 sps:$4 sm:$0xff]   ;;  %v2161_v5 = vld [vmem:[%s2783_s5 + $0x64] ss:$8 sps:$4 sm:$0xff]   ;;  %v2159_v8 = vld [vmem:[%s2783_s5 + $0x60] ss:$8 sps:$4 sm:$0xff]  }
  0x8b   : > { %1277 = vmatpush1.bf16.msra.mxu1 %v2203_v40  ;;  %v2224_v6 = vld [vmem:[#allocation6 + $0xa0] ss:$8 sps:$4 sm:$0xff]   ;;  %v2225_v7 = vld [vmem:[#allocation6 + $0xb4] ss:$8 sps:$4 sm:$0xff]   ;;  %v2164_v9 = vld [vmem:[%s2783_s5 + $0x74] ss:$8 sps:$4 sm:$0xff]  }
  0x8c   : > { %634 = vmatpush1.bf16.msra.mxu0 %v2111_v14  ;;  %1278 = vmatprep.subr.bf16.mxu1 %v2204_v41  ;;  %v2227_v10 = vld [vmem:[#allocation6 + $0xb0] ss:$8 sps:$4 sm:$0xff]   ;;  %v2228_v11 = vld [vmem:[#allocation6 + $0xc4] ss:$8 sps:$4 sm:$0xff]   ;;  %v2162_v12 = vld [vmem:[%s2783_s5 + $0x70] ss:$8 sps:$4 sm:$0xff]  }
  0x8d   : > { %635 = vmatprep.subr.bf16.mxu0 %v2112_v15  ;;  %v2167_v13 = vld [vmem:[%s2783_s5 + $0x84] ss:$8 sps:$4 sm:$0xff]   ;;  %v2230_v14 = vld [vmem:[#allocation6 + $0xc0] ss:$8 sps:$4 sm:$0xff]   ;;  %v2183_v28 = vld [vmem:[%s2783_s5 + $0xe0] ss:$8 sps:$4 sm:$0xff]  }
  0x8e   : > { %v2231_v15 = vld [vmem:[#allocation6 + $0xd4] ss:$8 sps:$4 sm:$0xff]   ;;  %v2188_v29 = vld [vmem:[%s2783_s5 + $0xf4] ss:$8 sps:$4 sm:$0xff]   ;;  %v2189_v31 = vld [vmem:[%s2658_s14] ss:$8 sps:$4 sm:$0xff]  }
  0x8f   : > { %1279 = vmatpush1.bf16.msra.mxu1 %v2206_v47  ;;  %v2233_v32 = vld [vmem:[#allocation6 + $0xd0] ss:$8 sps:$4 sm:$0xff]   ;;  %v2234_v33 = vld [vmem:[#allocation6 + $0xe4] ss:$8 sps:$4 sm:$0xff]   ;;  %v2240_v37 = vld [vmem:[#allocation7 + $0x80] ss:$8 sps:$4 sm:$0xff]  }
  0x90   : > { %636 = vmatpush1.bf16.msra.mxu0 %v2114_v16  ;;  %1280 = vmatprep.subr.bf16.mxu1 %v2207_v49  ;;  %v2165_v16 = vld [vmem:[%s2783_s5 + $0x80] ss:$8 sps:$4 sm:$0xff]  }
  0x91   : > { %750 = vmatprep.subr.bf16.mxu0 %v2117_v17  ;;  %v2170_v17 = vld [vmem:[%s2783_s5 + $0x94] ss:$8 sps:$4 sm:$0xff]   ;;  %v2239_v36 = vld [vmem:[#allocation6 + $0xf0] ss:$8 sps:$4 sm:$0xff]  }
  0x92   : > { %v1044_v41 = vld [vmem:[%s2784_s6] sm:$0x3] }
  0x93   : > { %654 = vmatmul.mubr.bf16.vlgmr.msra.gmra.mrb[0].mxu0 %v2118_v18  ;;  %1281 = vmatpush1.bf16.msra.mxu1 %v2209_v50  ;;  %v2168_v18 = vld [vmem:[%s2783_s5 + $0x90] ss:$8 sps:$4 sm:$0xff]  }
  0x94   : > { %751 = vmatpush1.bf16.msra.mxu0 %v2115_v19  ;;  %782 = vmatprep.mubr.bf16.mxu0 %v2426_v0  ;;  %v2153_v0 = vld [vmem:[%s2783_s5 + $0x40] ss:$8 sps:$4 sm:$0xff]   ;;  %v2173_v19 = vld [vmem:[%s2783_s5 + $0xa4] ss:$8 sps:$4 sm:$0xff]  }
  0x95   : > { %752 = vmatprep.subr.bf16.mxu0 %v2121_v20  ;;  %1282 = vmatprep.subr.bf16.mxu1 %v2210_v51  ;;  %v2171_v20 = vld [vmem:[%s2783_s5 + $0xa0] ss:$8 sps:$4 sm:$0xff]  }
  0x97   : > { %1283 = vmatpush1.bf16.msra.mxu1 %v2212_v54 }
  0x98   : > { %753 = vmatpush1.bf16.msra.mxu0 %v2119_v21  ;;  %1284 = vmatprep.subr.bf16.mxu1 %v2213_v55  ;;  %v2176_v21 = vld [vmem:[%s2783_s5 + $0xb4] ss:$8 sps:$4 sm:$0xff]  }
  0x99   : > { %754 = vmatprep.subr.bf16.mxu0 %v2124_v22  ;;  %v2174_v22 = vld [vmem:[%s2783_s5 + $0xb0] ss:$8 sps:$4 sm:$0xff]  }
  0x9b   : > { %1285 = vmatpush1.bf16.msra.mxu1 %v2215_v58 }
  0x9c   : > { %755 = vmatpush1.bf16.msra.mxu0 %v2122_v23  ;;  %1286 = vmatprep.subr.bf16.mxu1 %v2216_v59  ;;  %v2179_v23 = vld [vmem:[%s2783_s5 + $0xc4] ss:$8 sps:$4 sm:$0xff]   ;;  %v2241_v59 = vld [vmem:[#allocation7] ss:$8 sps:$4 sm:$0xff]  }
  0x9d   : > { %756 = vmatprep.subr.bf16.mxu0 %v2127_v24  ;;  %v2177_v24 = vld [vmem:[%s2783_s5 + $0xc0] ss:$8 sps:$4 sm:$0xff]  }
  0x9f   : > { %1287 = vmatpush1.bf16.msra.mxu1 %v2218_v62  ;;  %v2244_v62 = vld [vmem:[#allocation7 + $0xa0] ss:$8 sps:$4 sm:$0xff]  }
  0xa0   : > { %757 = vmatpush1.bf16.msra.mxu0 %v2125_v25  ;;  %1288 = vmatprep.subr.bf16.mxu1 %v2219_v63  ;;  %v2182_v25 = vld [vmem:[%s2783_s5 + $0xd4] ss:$8 sps:$4 sm:$0xff]   ;;  %v2245_v63 = vld [vmem:[#allocation7 + $0x20] ss:$8 sps:$4 sm:$0xff]  }
  0xa1   : > { %758 = vmatprep.subr.bf16.mxu0 %v2130_v26  ;;  %v2180_v26 = vld [vmem:[%s2783_s5 + $0xd0] ss:$8 sps:$4 sm:$0xff]  }
  0xa3   : > { %1289 = vmatpush1.bf16.msra.mxu1 %v2221_v2  ;;  %v2248_v2 = vld [vmem:[#allocation7 + $0xc0] ss:$8 sps:$4 sm:$0xff]  }
  0xa4   : > { %759 = vmatpush1.bf16.msra.mxu0 %v2128_v27  ;;  %1290 = vmatprep.subr.bf16.mxu1 %v2222_v3  ;;  %v2185_v27 = vld [vmem:[%s2783_s5 + $0xe4] ss:$8 sps:$4 sm:$0xff]   ;;  %v2249_v3 = vld [vmem:[#allocation7 + $0x40] ss:$8 sps:$4 sm:$0xff]  }
  0xa5   : > { %760 = vmatprep.subr.bf16.mxu0 %v2133_v30  ;;  %v2186_v30 = vld [vmem:[%s2783_s5 + $0xf0] ss:$8 sps:$4 sm:$0xff]  }
  0xa7   : > { %1291 = vmatpush1.bf16.msra.mxu1 %v2224_v6  ;;  %v2252_v6 = vld [vmem:[#allocation7 + $0xe0] ss:$8 sps:$4 sm:$0xff]  }
  0xa8   : > { %761 = vmatpush1.bf16.msra.mxu0 %v2131_v34  ;;  %1292 = vmatprep.subr.bf16.mxu1 %v2225_v7  ;;  %v2236_v34 = vld [vmem:[#allocation6 + $0xe0] ss:$8 sps:$4 sm:$0xff]  }
  0xa9   : > { %762 = vmatprep.subr.bf16.mxu0 %v2136_v35  ;;  %v2237_v35 = vld [vmem:[#allocation6 + $0xf4] ss:$8 sps:$4 sm:$0xff]   ;;  %v2253_v7 = vld [vmem:[#allocation7 + $0x60] ss:$8 sps:$4 sm:$0xff]  }
  0xab   : > { %1293 = vmatpush1.bf16.msra.mxu1 %v2227_v10  ;;  %v2256_v10 = vld [vmem:[#allocation7 + $0x84] ss:$8 sps:$4 sm:$0xff]  }
  0xac   : > { %763 = vmatpush1.bf16.msra.mxu0 %v2134_v38  ;;  %1294 = vmatprep.subr.bf16.mxu1 %v2228_v11  ;;  %v1046_v38 = vlaneseq  ;;  %v1098_v11 = vld [vmem:[%s2786_s8] sm:$0x3] }
  0xad   : > { %764 = vmatprep.subr.bf16.mxu0 %v2139_v39 }
  0xae   : > { %v1047_v39 = vshrl.u32 %v1046_v38, 7  ;;  %v2267_v38 = vld [vmem:[#allocation7 + $0x54] ss:$8 sps:$4 sm:$0xff]  }
  0xaf   : > { %1295 = vmatpush1.bf16.msra.mxu1 %v2230_v14 }
  0xb0   : > { %765 = vmatpush1.bf16.msra.mxu0 %v2137_v42  ;;  %1296 = vmatprep.subr.bf16.mxu1 %v2231_v15  ;;  %v1048_v40 = vsub.s32 0, %v1047_v39  ;;  %v1052_v42 = vsub.s32 1, %v1047_v39  ;;  %v2268_v39 = vld [vmem:[#allocation7 + $0xe4] ss:$8 sps:$4 sm:$0xff]  }
  0xb1   : > { %997 = vmatprep.subr.bf16.mxu0 %v2142_v43 }
  0xb2   : > { %v1049_v43 = vrot.slane %v1044_v41, %v1048_v40 }
  0xb3   : > { %783 = vmatmul.mubr.bf16.vlgmr.msra.gmra.mrb[0].mxu0 %v2143_v44  ;;  %1297 = vmatpush1.bf16.msra.mxu1 %v2233_v32  ;;  %v1053_v44 = vrot.slane %v1044_v41, %v1052_v42  ;;  %v2261_v32 = vld [vmem:[#allocation7 + $0x24] ss:$8 sps:$4 sm:$0xff]   ;;  %v2270_v41 = vld [vmem:[#allocation7 + $0xf4] ss:$8 sps:$4 sm:$0xff]  }
  0xb4   : > { %998 = vmatpush1.bf16.msra.mxu0 %v2140_v45  ;;  %1029 = vmatprep.mubr.bf16.mxu0 %v2191_v46 }
  0xb5   : > { %999 = vmatprep.subr.bf16.mxu0 %v2146_v48  ;;  %1298 = vmatprep.subr.bf16.mxu1 %v2234_v33  ;;  %v2262_v33 = vld [vmem:[#allocation7 + $0xb4] ss:$8 sps:$4 sm:$0xff]  }
  0xb7   : > { %1299 = vmatpush1.bf16.msra.mxu1 %v2236_v34  ;;  %v2263_v34 = vld [vmem:[#allocation7 + $0x34] ss:$8 sps:$4 sm:$0xff]  }
  0xb8   : > { %1000 = vmatpush1.bf16.msra.mxu0 %v2144_v52  ;;  %1300 = vmatprep.subr.bf16.mxu1 %v2237_v35  ;;  %v2264_v35 = vld [vmem:[#allocation7 + $0xc4] ss:$8 sps:$4 sm:$0xff]  }
  0xb9   : > { %1001 = vmatprep.subr.bf16.mxu0 %v2149_v53 }
  0xbb   : > { %1301 = vmatpush1.bf16.msra.mxu1 %v2239_v36  ;;  %v2265_v36 = vld [vmem:[#allocation7 + $0x44] ss:$8 sps:$4 sm:$0xff]  }
  0xbc   : > { %1002 = vmatpush1.bf16.msra.mxu0 %v2147_v56  ;;  %1987 = vmatprep.subr.bf16.mxu1 %v2240_v37  ;;  %v2266_v37 = vld [vmem:[#allocation7 + $0xd4] ss:$8 sps:$4 sm:$0xff]  }
  0xbd   : > { %1003 = vmatprep.subr.bf16.mxu0 %v2152_v57 }
  0xc0   : > { %1004 = vmatpush1.bf16.msra.mxu0 %v2150_v60  ;;  %v2242_v60 = vld [vmem:[#allocation7 + $0x90] ss:$8 sps:$4 sm:$0xff]  }
  0xc1   : > { %1005 = vmatprep.subr.bf16.mxu0 %v2155_v61  ;;  %v2243_v61 = vld [vmem:[#allocation7 + $0x10] ss:$8 sps:$4 sm:$0xff]  }
  0xc4   : > { %1006 = vmatpush1.bf16.msra.mxu0 %v2153_v0  ;;  %v2246_v0 = vld [vmem:[#allocation7 + $0xb0] ss:$8 sps:$4 sm:$0xff]  }
  0xc5   : > { %1007 = vmatprep.subr.bf16.mxu0 %v2158_v1  ;;  %v2247_v1 = vld [vmem:[#allocation7 + $0x30] ss:$8 sps:$4 sm:$0xff]  }
  0xc8   : > { %1008 = vmatpush1.bf16.msra.mxu0 %v2156_v4  ;;  %v2250_v4 = vld [vmem:[#allocation7 + $0xd0] ss:$8 sps:$4 sm:$0xff]  }
  0xc9   : > { %1009 = vmatprep.subr.bf16.mxu0 %v2161_v5  ;;  %v2251_v5 = vld [vmem:[#allocation7 + $0x50] ss:$8 sps:$4 sm:$0xff]  }
  0xcc   : > { %1010 = vmatpush1.bf16.msra.mxu0 %v2159_v8  ;;  %v2254_v8 = vld [vmem:[#allocation7 + $0xf0] ss:$8 sps:$4 sm:$0xff]  }
  0xcd   : > { %1011 = vmatprep.subr.bf16.mxu0 %v2164_v9  ;;  %v2255_v9 = vld [vmem:[#allocation7 + $0x70] ss:$8 sps:$4 sm:$0xff]  }
  0xd0   : > { %1012 = vmatpush1.bf16.msra.mxu0 %v2162_v12  ;;  %v1103_v12 = vrot.slane %v1098_v11, %v1048_v40  ;;  %v2269_v40 = vld [vmem:[#allocation7 + $0x64] ss:$8 sps:$4 sm:$0xff]  }
  0xd1   : > { %1013 = vmatprep.subr.bf16.mxu0 %v2167_v13  ;;  %v1107_v13 = vrot.slane %v1098_v11, %v1052_v42  ;;  %v2271_v42 = vld [vmem:[#allocation7 + $0x74] ss:$8 sps:$4 sm:$0xff]  }
  0xd4   : > { %1014 = vmatpush1.bf16.msra.mxu0 %v2165_v16 }
  0xd5   : > { %1015 = vmatprep.subr.bf16.mxu0 %v2170_v17 }
  0xd8   : > { %1016 = vmatpush1.bf16.msra.mxu0 %v2168_v18 }
  0xd9   : > { %1017 = vmatprep.subr.bf16.mxu0 %v2173_v19 }
  0xdc   : > { %1018 = vmatpush1.bf16.msra.mxu0 %v2171_v20 }
  0xdd   : > { %1019 = vmatprep.subr.bf16.mxu0 %v2176_v21 }
  0xe0   : > { %1020 = vmatpush1.bf16.msra.mxu0 %v2174_v22 }
  0xe1   : > { %1021 = vmatprep.subr.bf16.mxu0 %v2179_v23 }
  0xe4   : > { %1022 = vmatpush1.bf16.msra.mxu0 %v2177_v24 }
  0xe5   : > { %1023 = vmatprep.subr.bf16.mxu0 %v2182_v25 }
  0xe8   : > { %1024 = vmatpush1.bf16.msra.mxu0 %v2180_v26 }
  0xe9   : > { %1025 = vmatprep.subr.bf16.mxu0 %v2185_v27 }
  0xec   : > { %1026 = vmatpush1.bf16.msra.mxu0 %v2183_v28  ;;  %v2257_v28 = vld [vmem:[#allocation7 + $0x4] ss:$8 sps:$4 sm:$0xff]  }
  0xed   : > { %1027 = vmatprep.subr.bf16.mxu0 %v2188_v29  ;;  %v2258_v29 = vld [vmem:[#allocation7 + $0x94] ss:$8 sps:$4 sm:$0xff]  }
  0xf0   : > { %1028 = vmatpush1.bf16.msra.mxu0 %v2186_v30  ;;  %v2259_v30 = vld [vmem:[#allocation7 + $0x14] ss:$8 sps:$4 sm:$0xff]  }
  0xf3   : > { %1030 = vmatmul.mubr.bf16.vlgmr.msra.gmra.mrb[0].mxu0 %v2189_v31  ;;  %v2260_v31 = vld [vmem:[#allocation7 + $0xa4] ss:$8 sps:$4 sm:$0xff]  }
 0x1c6   : > { %v1031_v45 = vpop.f32.mrb[0].mxu0 }
 0x1c7   : > { %v1056_v46 = vadd.f32 %v1049_v43, %v1031_v45  ;;  %v1033_v47 = vpop.f32.mrb[1].mxu0 }
 0x1c8   : > { %v1057_v48 = vadd.f32 %v1053_v44, %v1033_v47  ;;  %v1035_v49 = vpop.f32.mrb[2].mxu0 }
 0x1c9   : > { %v1058_v50 = vadd.f32 %v1049_v43, %v1035_v49  ;;  %v1037_v51 = vpop.f32.mrb[3].mxu0  ;;  %v1060_v53 = vmax.f32 %v1056_v46, 0.0 }
 0x1ca   : > { %v1059_v52 = vadd.f32 %v1053_v44, %v1037_v51  ;;  %v1061_v55 = vmax.f32 %v1057_v48, 0.0  ;;  %v1945_v44 = vld [vmem:[%s2788_s10] ss:$0 sm:$0xff] }
 0x1cb   : > { %v1062_v54 = vmax.f32 %v1058_v50, 0.0 }
 0x1cc   : > { %v1063_v56 = vmax.f32 %v1059_v52, 0.0 }
 0x1cd   : > { %v1064_v57 = vpack.c.bf16 %v1062_v54, %v1060_v53 }
 0x1ce   : > { %v1065_v58 = vpack.c.bf16 %v1063_v56, %v1061_v55 }
 0x1d0   : > { %1302 = vmatprep.mubr.bf16.mxu1 %v1065_v58 }
 0x1d1   : > { %1303 = vmatmul.mubr.bf16.vlgmr.msra.gmra.mrb[0].mxu1 %v1064_v57 }
 0x1d2   : > { %1988 = vmatpush3.bf16.msra.mxu1 %v2241_v59 }
 0x1d3   : > { %1989 = vmatprep.subr.bf16.mxu1 %v2242_v60 }
 0x1d6   : > { %1990 = vmatpush3.bf16.msra.mxu1 %v2243_v61  ;;  %v1964_v61 = vld [vmem:[%s2788_s10 + $0x1] ss:$0 sm:$0xff] }
 0x1d7   : > { %1991 = vmatprep.subr.bf16.mxu1 %v2244_v62 }
 0x1da   : > { %1992 = vmatpush3.bf16.msra.mxu1 %v2245_v63 }
 0x1db   : > { %1993 = vmatprep.subr.bf16.mxu1 %v2246_v0 }
 0x1de   : > { %1994 = vmatpush3.bf16.msra.mxu1 %v2247_v1 }
 0x1df   : > { %1995 = vmatprep.subr.bf16.mxu1 %v2248_v2 }
 0x1e2   : > { %1996 = vmatpush3.bf16.msra.mxu1 %v2249_v3 }
 0x1e3   : > { %1997 = vmatprep.subr.bf16.mxu1 %v2250_v4 }
 0x1e6   : > { %1998 = vmatpush3.bf16.msra.mxu1 %v2251_v5 }
 0x1e7   : > { %1999 = vmatprep.subr.bf16.mxu1 %v2252_v6 }
 0x1ea   : > { %2000 = vmatpush3.bf16.msra.mxu1 %v2253_v7 }
 0x1eb   : > { %2001 = vmatprep.subr.bf16.mxu1 %v2254_v8 }
 0x1ee   : > { %2002 = vmatpush3.bf16.msra.mxu1 %v2255_v9 }
 0x1ef   : > { %2009 = vmatprep.subr.bf16.mxu1 %v2256_v10 }
 0x2a4   : > { %v1304_v14 = vpop.f32.mrb[0].mxu1 }
 0x2a5   : > { %v1305_v15 = vadd.f32 %v1304_v14, %v1103_v12  ;;  %v1306_v16 = vpop.f32.mrb[1].mxu1 }
 0x2a6   : > { %v1307_v17 = vadd.f32 %v1306_v16, %v1107_v13  ;;  %v1308_v18 = vpop.f32.mrb[2].mxu1 }
 0x2a7   : > { %v1309_v19 = vadd.f32 %v1308_v18, %v1103_v12  ;;  %v1310_v20 = vpop.f32.mrb[3].mxu1  ;;  %v1313_v22 = vmax.f32 %v1305_v15, 0.0 }
 0x2a8   : > { %v1311_v21 = vadd.f32 %v1310_v20, %v1107_v13  ;;  %v1314_v24 = vmax.f32 %v1307_v17, 0.0 }
 0x2a9   : > { %v1315_v23 = vmax.f32 %v1309_v19, 0.0 }
 0x2aa   : > { %v1316_v25 = vmax.f32 %v1311_v21, 0.0 }
 0x2ab   : > { %v1317_v26 = vpack.c.bf16 %v1315_v23, %v1313_v22 }
 0x2ac   : > { %v1318_v27 = vpack.c.bf16 %v1316_v25, %v1314_v24 }
 0x2ae   : > { %1486 = vmatprep.mubr.bf16.mxu1 %v1318_v27 }
 0x2af   : > { %1487 = vmatmul.mubr.bf16.vlgmr.msra.gmra.mrb[4].mxu1 %v1317_v26 }
 0x2b0   : > { %2010 = vmatpush3.bf16.msra.mxu1 %v2257_v28  ;;  %1676 = vmatprep.mubr.bf16.mxu1 %v1318_v27 }
 0x2b1   : > { %2011 = vmatprep.subr.bf16.mxu1 %v2258_v29 }
 0x2b4   : > { %2012 = vmatpush3.bf16.msra.mxu1 %v2259_v30 }
 0x2b5   : > { %2013 = vmatprep.subr.bf16.mxu1 %v2260_v31 }
 0x2b8   : > { %2014 = vmatpush3.bf16.msra.mxu1 %v2261_v32 }
 0x2b9   : > { %2015 = vmatprep.subr.bf16.mxu1 %v2262_v33 }
 0x2bc   : > { %2016 = vmatpush3.bf16.msra.mxu1 %v2263_v34 }
 0x2bd   : > { %2017 = vmatprep.subr.bf16.mxu1 %v2264_v35 }
 0x2c0   : > { %2018 = vmatpush3.bf16.msra.mxu1 %v2265_v36 }
 0x2c1   : > { %2019 = vmatprep.subr.bf16.mxu1 %v2266_v37 }
 0x2c4   : > { %2020 = vmatpush3.bf16.msra.mxu1 %v2267_v38 }
 0x2c5   : > { %2021 = vmatprep.subr.bf16.mxu1 %v2268_v39 }
 0x2c8   : > { %2022 = vmatpush3.bf16.msra.mxu1 %v2269_v40 }
 0x2c9   : > { %2023 = vmatprep.subr.bf16.mxu1 %v2270_v41 }
 0x2cc   : > { %2024 = vmatpush3.bf16.msra.mxu1 %v2271_v42 }
 0x2cf   : > { %1677 = vmatmul.mubr.bf16.vlgmr.msra.gmra.mrb[8].mxu1 %v1317_v26 }
 0x382   : > { %v2003_v43 = vpop.f32.mrb[4].mxu1 }
 0x383   : > { %v2004_v45 = vpop.f32.mrb[5].mxu1 }
 0x384   : > { %v2005_v46 = vadd.f32 %v2004_v45, %v2003_v43  ;;  %v2006_v47 = vpop.f32.mrb[6].mxu1 }
 0x385   : > { %v2007_v48 = vpop.f32.mrb[7].mxu1 }
 0x386   : > { %v1489_v49 = vadd.f32 %v2005_v46, %v1945_v44  ;;  %v2008_v50 = vadd.f32 %v2007_v48, %v2006_v47 }
 0x388   : > { %v1962_v51 = vmul.f32 -1.442695, %v1489_v49  ;;  %v1492_v52 = vadd.f32 %v2008_v50, %v1945_v44 }
 0x38a   : > { %2272 = vpow2.f32 %v1962_v51  ;;  %v1963_v53 = vmul.f32 -1.442695, %v1492_v52 }
 0x38c   : > { %2274 = vpow2.f32 %v1963_v53 }
 0x394   : > { %v2273_v54 = vpop.eup %2272 }
 0x395   : > { %v1501_v55 = vadd.f32 1.0, %v2273_v54 }
 0x396   : > { %v2275_v56 = vpop.eup %2274 }
 0x397   : > { %2276 = vrcp.f32 %v1501_v55  ;;  %v1502_v57 = vadd.f32 1.0, %v2275_v56 }
 0x399   : > { %2278 = vrcp.f32 %v1502_v57 }
 0x3a1   : > { %v2277_v58 = vpop.eup %2276 }
 0x3a2   : > { %1507 = vst [vmem:[%s496_s24] sm:$0xff] %v2277_v58  ;;  %v2025_v59 = vpop.f32.mrb[8].mxu1 }
 0x3a3   : > { %v2279_v60 = vpop.eup %2278  ;;  %v2026_v62 = vpop.f32.mrb[9].mxu1 }
 0x3a4   : > { %1508 = vst [vmem:[%s496_s24 + $0x10] sm:$0xff] %v2279_v60  ;;  %v2027_v63 = vadd.f32 %v2026_v62, %v2025_v59  ;;  %v2028_v0 = vpop.f32.mrb[10].mxu1 }
 0x3a5   : > { %v2029_v1 = vpop.f32.mrb[11].mxu1 }
 0x3a6   : > { %v1679_v2 = vadd.f32 %v2027_v63, %v1964_v61  ;;  %v2030_v3 = vadd.f32 %v2029_v1, %v2028_v0 }
 0x3a8   : > { %v1981_v4 = vmul.f32 -1.442695, %v1679_v2  ;;  %v1682_v5 = vadd.f32 %v2030_v3, %v1964_v61 }
 0x3aa   : > { %2280 = vpow2.f32 %v1981_v4  ;;  %v1982_v6 = vmul.f32 -1.442695, %v1682_v5 }
 0x3ac   : > { %2282 = vpow2.f32 %v1982_v6 }
 0x3b4   : > { %v2281_v7 = vpop.eup %2280 }
 0x3b5   : > { %v1691_v8 = vadd.f32 1.0, %v2281_v7 }
 0x3b6   : > { %v2283_v9 = vpop.eup %2282 }
 0x3b7   : > { %2284 = vrcp.f32 %v1691_v8  ;;  %v1692_v10 = vadd.f32 1.0, %v2283_v9 }
 0x3b9   : > { %2286 = vrcp.f32 %v1692_v10 }
 0x3c1   : > { %v2285_v11 = vpop.eup %2284 }
 0x3c2   : > { %1697 = vst [vmem:[%s496_s24 + $0x8] sm:$0xff] %v2285_v11 }
 0x3c3   : > { %v2287_v12 = vpop.eup %2286 }
 0x3c4   : > { %1698 = vst [vmem:[%s496_s24 + $0x18] sm:$0xff] %v2287_v12 }
 0x3c5 PF: > { %s24_s17 = sadd.s32 1, %s2418_s17  }
 0x3c6   : > { %p21_p3 = scmp.ge.s32.totalorder %s24_s17, 4  }
 0x3c8   :  { %23 = sbr.rel (!%p21_p3) target bundleno = 5 (0x5), region = 117 }
 0x3cf   :  { %1723 = vsyncpa [#allocation3], 1 }
 0x3d0   :  { %1725 = vsyncpa [#allocation3 + $0x1], 1 }
 0x3d1   :  { %1726 = vsyncpa [#allocation5], 1 }
 0x3d2   :  { %1727 = vsyncpa [#allocation8], 1 }

</bundles_post_ra>
